<compile_context>
chip_gen: v5e
topology: v5e:2x2
jax: 0.10.0
libtpu: 0.0.40
codegen_flags: <defaults>
</compile_context>

<pallas_src>
import functools

import jax
import jax.numpy as jnp
from jax.experimental import pallas as pl
from jax.experimental.pallas import tpu as pltpu

_LANES = 128


def _min_sublanes(dtype) -> int:
    """Minimum sublane tile for a dtype (f32: 8, bf16/f16: 16, int8/bool: 32)."""
    itemsize = jnp.dtype(dtype).itemsize
    return {4: 8, 2: 16, 1: 32}.get(itemsize, 8)


def _round_up(x: int, m: int) -> int:
    return ((x + m - 1) // m) * m


def _focal_elementwise(x, t, alpha, gamma, *, use_approx_recip):
    """Focal-loss math on f32 arrays (numerically stable BCE-with-logits)."""
    e = jnp.exp(-jnp.abs(x))                      # in [0, 1]
    one_plus_e = 1.0 + e
    if use_approx_recip:
        r = pl.reciprocal(one_plus_e, approx=True)  # EUP vrcp (free slot)
        r = r * (2.0 - one_plus_e * r)              # one Newton step -> rtol<1e-6
    else:
        r = 1.0 / one_plus_e
    # Stable BCE-with-logits: max(x,0) - x*t + log(1 + exp(-|x|)); reuse 1+e.
    ce = jnp.maximum(x, 0.0) - x * t + jnp.log(one_plus_e)
    # sigmoid(x): 1/(1+e) for x>=0, e/(1+e) for x<0.
    p = jnp.where(x >= 0.0, r, e * r)

    one_minus_pt = p + t - 2.0 * (p * t)          # == 1 - p_t (folded)

    if alpha == 1.0:
        alpha_t = t                               # alpha*t + (1-alpha)*(1-t) == t
    else:
        alpha_t = (2.0 * alpha - 1.0) * t + (1.0 - alpha)

    g = float(gamma)
    if g == 0.0:
        weight = alpha_t
    elif g.is_integer() and 0.0 < g <= 4.0:
        # Integer gamma: VPU multiplies instead of exp(g*log(u)) on the EUP.
        pw = one_minus_pt
        for _ in range(int(g) - 1):
            pw = pw * one_minus_pt
        weight = alpha_t * pw
    else:
        weight = alpha_t * one_minus_pt ** g
    return weight * ce


def _focal_loss_kernel(x_ref, t_ref, out_ref, *, alpha, gamma, row_tile,
                       total_rows):
    # Cast after the DMA -> narrow dtypes keep a narrow HBM footprint.
    x = x_ref[...].astype(jnp.float32)
    t = t_ref[...].astype(jnp.float32)

    focal = _focal_elementwise(x, t, alpha, gamma, use_approx_recip=True)

    def _write(vals):
        # Vreg-shaped partial sum: (row_tile, 128) -> (8, 128), pure VPU adds.
        out_ref[...] = jnp.sum(vals.reshape(row_tile // 8, 8, _LANES), axis=0)

    if total_rows % row_tile == 0:
        # All blocks are full: no masking anywhere.
        _write(focal)
    else:
        i = pl.program_id(0)
        last = pl.num_programs(0) - 1

        @pl.when(i != last)
        def _():
            # Steady-state fast path: no iota/compare/select filler.
            _write(focal)

        @pl.when(i == last)
        def _():
            # Only the last block can contain rows past the end of the array.
            row = jax.lax.broadcasted_iota(jnp.int32, (row_tile, _LANES), 0)
            valid = (i * row_tile + row) < total_rows
            _write(jnp.where(valid, focal, 0.0))


def _focal_sum_small(x, t, alpha, gamma):
    """Pure-XLA focal sum for tiny pieces (ragged tail / sub-tile inputs)."""
    x = x.astype(jnp.float32)
    t = t.astype(jnp.float32)
    return jnp.sum(
        _focal_elementwise(x, t, alpha, gamma, use_approx_recip=False),
        dtype=jnp.float32)


def focal_loss(inputs, targets, alpha=1.0, gamma=2.0, *, row_tile=4096):
    """Sigmoid focal loss with mean reduction (matches the PyTorch module)."""
    assert inputs.shape == targets.shape
    n_elems = inputs.size
    assert n_elems > 0
    alpha = float(alpha)
    gamma = float(gamma)

    # Flatten (free bitcast). No wrapper-side dtype cast (would add an HBM pass).
    flat_x = inputs.reshape(-1)
    flat_t = targets.reshape(-1)

    mult = max(_min_sublanes(inputs.dtype), _min_sublanes(targets.dtype))
    rem = n_elems % _LANES
    bulk = n_elems - rem
    bulk_rows = bulk // _LANES

    if bulk_rows < mult:
        # Tiny input: kernel launch / min-tile overhead isn't worth it.
        return _focal_sum_small(flat_x, flat_t, alpha, gamma) / jnp.float32(n_elems)

    tail_sum = jnp.float32(0.0)
    if rem:
        # Ragged tail (<128 elems) handled by a tiny XLA expression; no
        # full-array jnp.pad. The prefix slice below may still materialize a
        # copy for ragged sizes; the multiple-of-128 case is fully copy-free.
        tail_sum = _focal_sum_small(flat_x[bulk:], flat_t[bulk:], alpha, gamma)
        flat_x = flat_x[:bulk]
        flat_t = flat_t[:bulk]

    x2d = flat_x.reshape(bulk_rows, _LANES)
    t2d = flat_t.reshape(bulk_rows, _LANES)

    # Row tile: large (amortizes ~0.35us/step), a multiple of the min sublane
    # tile, and capped so the grid has >= 2 blocks for v7x megacore sharding.
    rt = min(int(row_tile), _round_up(pl.cdiv(bulk_rows, 2), mult))
    rt = max(_round_up(rt, mult), mult)
    n_blocks = pl.cdiv(bulk_rows, rt)

    kernel = functools.partial(
        _focal_loss_kernel,
        alpha=alpha,
        gamma=gamma,
        row_tile=rt,
        total_rows=bulk_rows,
    )

    bytes_accessed = (x2d.size * x2d.dtype.itemsize
                      + t2d.size * t2d.dtype.itemsize
                      + n_blocks * 8 * _LANES * 4)

    partials = pl.pallas_call(
        kernel,
        out_shape=jax.ShapeDtypeStruct((n_blocks * 8, _LANES), jnp.float32),
        grid_spec=pltpu.PrefetchScalarGridSpec(
            num_scalar_prefetch=0,
            grid=(n_blocks,),
            in_specs=[
                pl.BlockSpec((rt, _LANES), lambda i: (i, 0)),
                pl.BlockSpec((rt, _LANES), lambda i: (i, 0)),
            ],
            out_specs=pl.BlockSpec((8, _LANES), lambda i: (i, 0)),
        ),
        compiler_params=pltpu.CompilerParams(
            dimension_semantics=("parallel",),
        ),
        cost_estimate=pl.CostEstimate(
            flops=22 * bulk,
            transcendentals=3 * bulk,
            bytes_accessed=bytes_accessed,
        ),
    )(x2d, t2d)

    # Tiny final reduction (n_blocks*8*128 f32) left to XLA.
    total = jnp.sum(partials, dtype=jnp.float32) + tail_sum
    return total / jnp.float32(n_elems)


def focal_loss_ref(inputs, targets, alpha=1.0, gamma=2.0):
    """Pure-JAX reference matching the PyTorch module."""
    x = inputs.astype(jnp.float32)
    t = targets.astype(jnp.float32)
    p = jax.nn.sigmoid(x)
    ce = jnp.maximum(x, 0.0) - x * t + jnp.log1p(jnp.exp(-jnp.abs(x)))
    p_t = p * t + (1.0 - p) * (1.0 - t)
    alpha_t = alpha * t + (1.0 - alpha) * (1.0 - t)
    focal = alpha_t * (1.0 - p_t) ** gamma * ce
    return jnp.mean(focal)


if __name__ == "__main__":
    key = jax.random.PRNGKey(0)
    k1, k2, k3, k4, k5, k6 = jax.random.split(key, 6)

    # Case 1: NCHW layout as in the PyTorch module, defaults alpha=1, gamma=2.
    # 2048 elements -> multiple of 128 (copy-free fast path), 2 grid blocks.
    shape = (2, 4, 16, 16)
    x1 = jax.random.normal(k1, shape, dtype=jnp.float32) * 2.0
    t1 = (jax.random.uniform(k2, shape) > 0.5).astype(jnp.float32)
    out1 = jax.block_until_ready(focal_loss(x1, t1, alpha=1.0, gamma=2.0))
    ref1 = focal_loss_ref(x1, t1, alpha=1.0, gamma=2.0)
    assert jnp.allclose(out1, ref1, rtol=1e-5, atol=1e-6), (out1, ref1)

    # Case 2: ragged size (1326 = 10*128 + 46) + non-trivial alpha:
    # exercises the masked last kernel block and the XLA tail path.
    shape2 = (2, 3, 17, 13)
    x2 = jax.random.normal(k3, shape2, dtype=jnp.float32) * 3.0
    t2 = (jax.random.uniform(k4, shape2) > 0.5).astype(jnp.float32)
    out2 = jax.block_until_ready(focal_loss(x2, t2, alpha=0.25, gamma=2.0))
    ref2 = focal_loss_ref(x2, t2, alpha=0.25, gamma=2.0)
    assert jnp.allclose(out2, ref2, rtol=1e-5, atol=1e-6), (out2, ref2)

    # Case 3: bf16 logits (narrow-dtype HBM path; cast happens in-kernel,
    # 16-row min sublane tile).
    shape3 = (4, 4, 16, 16)
    x3 = (jax.random.normal(k5, shape3, dtype=jnp.float32) * 2.0).astype(jnp.bfloat16)
    t3 = (jax.random.uniform(k6, shape3) > 0.5).astype(jnp.float32)
    out3 = jax.block_until_ready(focal_loss(x3, t3, alpha=1.0, gamma=2.0))
    ref3 = focal_loss_ref(x3, t3, alpha=1.0, gamma=2.0)
    assert jnp.allclose(out3, ref3, rtol=1e-5, atol=1e-6), (out3, ref3)

    # Case 4: tiny input (fewer rows than one min tile) -> pure-XLA fallback,
    # integer gamma=3 specialization.
    shape4 = (3, 5, 7)
    x4 = jax.random.normal(k1, shape4, dtype=jnp.float32)
    t4 = (jax.random.uniform(k2, shape4) > 0.5).astype(jnp.float32)
    out4 = jax.block_until_ready(focal_loss(x4, t4, alpha=1.0, gamma=3.0))
    ref4 = focal_loss_ref(x4, t4, alpha=1.0, gamma=3.0)
    assert jnp.allclose(out4, ref4, rtol=1e-5, atol=1e-6), (out4, ref4)

    print("KERNEL_OK")
</pallas_src>

<mosaic_0001>
module attributes {stable_mosaic.version = 11 : i64} {
  func.func @_focal_loss_kernel(%arg0: i32, %arg1: memref<8x128xf32, #tpu.memory_space<vmem>>, %arg2: memref<8x128xf32, #tpu.memory_space<vmem>>, %arg3: memref<8x128xf32, #tpu.memory_space<vmem>>) attributes {dimension_semantics = [#tpu.dimension_semantics<parallel>], iteration_bounds = array<i64: 2>, scalar_prefetch = 0 : i64, scratch_operands = 0 : i64, tpu.core_type = #tpu.core_type<tc>, window_params = [{transform_indices = @transform_0, window_bounds = array<i64: 8, 128>}, {transform_indices = @transform_1, window_bounds = array<i64: 8, 128>}, {transform_indices = @transform_2, window_bounds = array<i64: 8, 128>}]} {
    %c0 = arith.constant 0 : index
    %c0_0 = arith.constant 0 : index
    %0 = vector.load %arg1[%c0, %c0_0] : memref<8x128xf32, #tpu.memory_space<vmem>>, vector<8x128xf32>
    %c0_1 = arith.constant 0 : index
    %c0_2 = arith.constant 0 : index
    %1 = vector.load %arg2[%c0_1, %c0_2] : memref<8x128xf32, #tpu.memory_space<vmem>>, vector<8x128xf32>
    %2 = math.absf %0 : vector<8x128xf32>
    %cst = arith.constant 0.000000e+00 : f32
    %3 = vector.broadcast %cst : f32 to vector<8x128xf32>
    %4 = arith.subf %3, %2 : vector<8x128xf32>
    %5 = math.exp %4 : vector<8x128xf32>
    %cst_3 = arith.constant 1.000000e+00 : f32
    %6 = vector.broadcast %cst_3 : f32 to vector<8x128xf32>
    %7 = arith.addf %6, %5 : vector<8x128xf32>
    %8 = tpu.reciprocal %7 {approx = true} : vector<8x128xf32> -> vector<8x128xf32>
    %9 = arith.mulf %7, %8 : vector<8x128xf32>
    %cst_4 = arith.constant 2.000000e+00 : f32
    %10 = vector.broadcast %cst_4 : f32 to vector<8x128xf32>
    %11 = arith.subf %10, %9 : vector<8x128xf32>
    %12 = arith.mulf %8, %11 : vector<8x128xf32>
    %cst_5 = arith.constant 0.000000e+00 : f32
    %13 = vector.broadcast %cst_5 : f32 to vector<8x128xf32>
    %14 = arith.maximumf %0, %13 : vector<8x128xf32>
    %15 = arith.mulf %0, %1 : vector<8x128xf32>
    %16 = arith.subf %14, %15 : vector<8x128xf32>
    %17 = math.log %7 : vector<8x128xf32>
    %18 = arith.addf %16, %17 : vector<8x128xf32>
    %cst_6 = arith.constant 0.000000e+00 : f32
    %19 = vector.broadcast %cst_6 : f32 to vector<8x128xf32>
    %20 = arith.cmpf oge, %0, %19 : vector<8x128xf32>
    %21 = arith.mulf %5, %12 : vector<8x128xf32>
    %22 = arith.select %20, %12, %21 : vector<8x128xi1>, vector<8x128xf32>
    %23 = arith.addf %22, %1 : vector<8x128xf32>
    %24 = arith.mulf %22, %1 : vector<8x128xf32>
    %cst_7 = arith.constant 2.000000e+00 : f32
    %25 = vector.broadcast %cst_7 : f32 to vector<8x128xf32>
    %26 = arith.mulf %25, %24 : vector<8x128xf32>
    %27 = arith.subf %23, %26 : vector<8x128xf32>
    %28 = arith.mulf %27, %27 : vector<8x128xf32>
    %29 = arith.mulf %1, %28 : vector<8x128xf32>
    %30 = arith.mulf %29, %18 : vector<8x128xf32>
    %31 = vector.shape_cast %30 : vector<8x128xf32> to vector<1x8x128xf32>
    %cst_8 = arith.constant dense<0.000000e+00> : vector<8x128xf32>
    %32 = vector.multi_reduction <add>, %31, %cst_8 [0] : vector<1x8x128xf32> to vector<8x128xf32>
    %c0_9 = arith.constant 0 : index
    %c0_10 = arith.constant 0 : index
    %33 = vector.load %arg3[%c0_9, %c0_10] : memref<8x128xf32, #tpu.memory_space<vmem>>, vector<8x128xf32>
    tpu.vector_store %arg3[%c0_9, %c0_10], %32 {strides = array<i32>} : memref<8x128xf32, #tpu.memory_space<vmem>>, vector<8x128xf32>,
    return
  }
  func.func @transform_0(%arg0: i32) -> (i32, i32) {
    %c0_i32 = arith.constant 0 : i32
    %c0_i32_0 = arith.constant 0 : i32
    return %arg0, %c0_i32 : i32, i32
  }
  func.func @transform_1(%arg0: i32) -> (i32, i32) {
    %c0_i32 = arith.constant 0 : i32
    %c0_i32_0 = arith.constant 0 : i32
    return %arg0, %c0_i32 : i32, i32
  }
  func.func @transform_2(%arg0: i32) -> (i32, i32) {
    %c0_i32 = arith.constant 0 : i32
    %c0_i32_0 = arith.constant 0 : i32
    return %arg0, %c0_i32 : i32, i32
  }
}

</mosaic_0001>

<bundles_post_ra>
// kernel: tpu_custom_call.1
= control target key start
LH: loop header
LB: loop body
LE: loop exit
PB: predicated region body
PF: predicated region fallthrough
CT: control target
= control target key end

     0   :  { %7 = vsyncpa [#allocation3], 0  ;;  %s722_s0 = inlined_call_operand.hbm [shape: f32[16,128], index: 0, kind: input, shape index: {}]   ;;  %s723_s1 = inlined_call_operand.hbm [shape: f32[16,128], index: 1, kind: input, shape index: {}]   ;;  %s724_s2 = inlined_call_operand.hbm [shape: f32[16,128], index: 2, kind: output, shape index: {}]  }
   0x1   :  { %9 = vsyncpa [#allocation3 + $0x1], 0 }
   0x2   :  { %10 = vsyncpa [#allocation6], 0 }
   0x3   :  { %12 = vsyncpa [#allocation6 + $0x1], 0 }
   0x4   :  { %13 = vsyncpa [#allocation4], 0 }
   0x5   :  { %15 = vsyncpa [#allocation4 + $0x1], 0  ;;  %s557_s9 = smov 0   ;;  %s559_s10 = smov 0  }
   0x6   :  { %s561_s11 = smov 0   ;;  %s563_s12 = smov 0  }
   0x7 LB: > { %s578_s13 = sadd.s32 4294967295, %s540_s12   ;;  %s338_s14 = sadd.s32 4294967294, %s540_s12   ;;  %s540_s12 = sphi %s563_s12, %s735_s12   ;;  %s536_s11 = sphi %s561_s11, %s734_s11   ;;  %s532_s10 = sphi %s559_s10, %s733_s10   ;;  %s528_s9 = sphi %s557_s9, %s732_s9  }
   0x8   : > { %s582_s15 = sadd.s32 1, %s540_s12   ;;  %s28_s16 = sadd.s32 1, %s536_s11 }
   0x9   : > { %s25_s17 = ssub.s32 %s540_s12, %s582_s15  ;;  %p35_p0 = scmp.ne.s32.totalorder %s536_s11, %s532_s10 }
   0xa   : > { %p26_p1 = scmp.eq.s32.totalorder %s25_s17, 0  ;;  %p36_p2 = scmp.eq.s32.totalorder %s540_s12, 0 }
   0xb   : > { %p41_p3 = scmp.ne.s32.totalorder %s532_s10, %s528_s9  ;;  %p42_p4 = scmp.eq.s32.totalorder %s578_s13, 0 }
   0xc   : > { %s594_s18 = scalar_select %p26_p1, %s536_s11, %s28_s16  }
   0xd   : > { %p596_p5 = por %p36_p2, %p35_p0  ;;  %p600_p6 = por %p42_p4, %p41_p3 }
   0xe   : > { %p91_p7 = scmp.eq.s32.totalorder %s578_s13, 1  ;;  %p97_p8 = scmp.eq.s32.totalorder %s338_s14, 1 }
   0xf   : > { %p370_p10 = scmp.lt.s32.totalorder %s540_s12, 2  ;;  %s616_s23 = sand.u32 1, %s536_s11  }
  0x10   : > { %p607_p11 = por %p91_p7, %p35_p0  ;;  %p611_p12 = por %p97_p8, %p41_p3 }
  0x11   : > { %s342_s24 = sshll.u32 %s540_s12, 3  ;;  %s341_s25 = sshll.u32 %s616_s23, 3 }
  0x12   : > { %s125_s28 = scalar_lea.hbm %s722_s0, %s342_s24  ;;  %s121_s30 = scalar_lea.vmem [#allocation2], %s341_s25 }
  0x13   : > { %s127_s29 = sshll.u32 %s125_s28, 4  ;;  %s129_s3 = sshll.u32 %s121_s30, 4  ;;  %s128_s29 = int_to_ptr.hbm [resolvable:$true] %s127_s29  ;;  %s130_s3 = int_to_ptr.vmem [resolvable:$true] %s129_s3 }
  0x14   : > { %p625_p13 = pnand %p370_p10, %p596_p5  ;;  %p345_p0 = scmp.ge.s32.totalorder %s540_s12, 1 }
  0x15   : > { %p153_p1 = scmp.lt.s32.totalorder %s540_s12, 3  ;;  %s118_s5 = scalar_lea.sflag [#allocation3], %s616_s23 }
  0x16   : > { %s410_s6 = sshra.s32 %s128_s29, 4  ;;  %p414_p3 = pneg %p625_p13  ;;  %s411_s6 = int_to_ptr.hbm [resolvable:$true] %s410_s6 }
  0x17   : > { %s412_s7 = scalar_lea.hbm %s411_s6, 8  ;;  %s417_s16 = scalar_lea.hbm %s722_s0, 16 }
  0x18   : > { %p413_p2 = scmp.ne.s32.totalorder %s411_s6, %s412_s7  ;;  %p418_p5 = scmp.lt.s32.totalorder %s411_s6, %s722_s0 }
  0x19   : > { %p419_p8 = scmp.lt.s32.totalorder %s417_s16, %s412_s7 }
  0x1a   : > { %p415_p4 = pnand %p414_p3, %p413_p2 }
  0x1b   : > { %p420_p10 = por %p419_p8, %p418_p5 }
  0x1c   : > { %p416_p7 = pneg %p415_p4 }
  0x1e   : > { %p421_p9 = pnand %p420_p10, %p416_p7 }
  0x20   : > { %424 = shalt.err (!%p421_p9)
}
  0x21   : > { %362 = dma.hbm_to_vmem [thread:$0]  (!%p625_p13), %s128_s29, 128, %s130_s3, %s118_s5  }
  0x22   : > { %p649_p2 = pnand %p345_p0, %p153_p1  ;;  %s144_s30 = scalar_lea.hbm %s723_s1, %s342_s24 }
  0x23   : > { %s146_s6 = sshll.u32 %s144_s30, 4  ;;  %s140_s7 = scalar_lea.vmem [#allocation5], %s341_s25  ;;  %s147_s6 = int_to_ptr.hbm [resolvable:$true] %s146_s6 }
  0x24   : > { %s148_s8 = sshll.u32 %s140_s7, 4  ;;  %s137_s14 = scalar_lea.sflag [#allocation6], %s616_s23  ;;  %s149_s8 = int_to_ptr.vmem [resolvable:$true] %s148_s8 }
  0x25   : > { %s440_s16 = sshra.s32 %s147_s6, 4  ;;  %s447_s5 = scalar_lea.hbm %s723_s1, 16  ;;  %s441_s16 = int_to_ptr.hbm [resolvable:$true] %s440_s16 }
  0x26   : > { %s442_s17 = scalar_lea.hbm %s441_s16, 8  ;;  %p448_p4 = scmp.lt.s32.totalorder %s441_s16, %s723_s1 }
  0x27   : > { %p443_p9 = scmp.ne.s32.totalorder %s441_s16, %s442_s17  ;;  %p449_p7 = scmp.lt.s32.totalorder %s447_s5, %s442_s17 }
  0x29   : > { %p445_p0 = pnand %p443_p9, %p414_p3  ;;  %p450_p5 = por %p449_p7, %p448_p4 }
  0x2b   : > { %p446_p1 = pneg %p445_p0 }
  0x2d   : > { %p451_p8 = pnand %p450_p5, %p446_p1 }
  0x2f   : > { %454 = shalt.err (!%p451_p8)
}
  0x30   : > { %365 = dma.hbm_to_vmem [thread:$0]  (!%p625_p13), %s147_s6, 128, %s149_s8, %s137_s14  }
  0x31   : > { %157 = sbr.rel (%p649_p2) target bundleno = 104 (0x68), region = 28  ;;  %s671_s23 = sand.u32 (!%p649_p2), 1, %s532_s10  }
  0x32   : > { %s674_s25 = sshll.u32 (!%p649_p2), %s671_s23, 3  ;;  %s160_s27 = scalar_lea.sflag (!%p649_p2), [#allocation3], %s671_s23 }
  0x33   : > { %s163_s28 = scalar_lea.vmem (!%p649_p2), [#allocation2], %s674_s25 }
  0x36   : > { %515 = dma.done.wait (%p600_p6), %s160_s27, 128  }
  0x37   : > { %517 = vsyncadd (%p600_p6), %s160_s27, 4294967168  ;;  %s170_s4 = scalar_lea.sflag [#allocation6], %s671_s23  ;;  %s173_s26 = scalar_lea.vmem [#allocation5], %s674_s25 }
  0x38   : > { %519 = dma.done.wait (%p600_p6), %s170_s4, 128  }
  0x39   : > { %521 = vsyncadd (%p600_p6), %s170_s4, 4294967168  ;;  %v200_v0 = vld [vmem:[%s163_s28] sm:$0xff]  ;;  %v201_v10 = vld [vmem:[%s173_s26] sm:$0xff]  ;;  %s350_s20 = sshll.u32 %s578_s13, 3  ;;  %s199_s8 = scalar_lea.vmem [#allocation7], %s674_s25 }
  0x3a   : > { %v202_v1 = vand.u32 2147483647, %v200_v0  ;;  %vm217_vm0 = vcmp.ge.f32.partialorder %v200_v0, 0.0  ;;  %v211_v12 = vmax.f32 %v200_v0, 0.0  ;;  %v212_v13 = vmul.f32 %v201_v10, %v200_v0  ;;  %s240_s7 = scalar_lea.hbm %s724_s2, %s350_s20  ;;  %s242_s14 = sshll.u32 %s199_s8, 4  ;;  %s243_s14 = int_to_ptr.vmem [resolvable:$true] %s242_s14 }
  0x3b   : > { %s244_s16 = sshll.u32 %s240_s7, 4  ;;  %s230_s13 = scalar_lea.sflag [#allocation4], %s671_s23  ;;  %s245_s16 = int_to_ptr.hbm [resolvable:$true] %s244_s16 }
  0x3c   : > { %v203_v2 = vsub.f32 0.0, %v202_v1  ;;  %v213_v18 = vsub.f32 %v211_v12, %v212_v13  ;;  %s484_s17 = sshra.s32 %s245_s16, 4  ;;  %s490_s19 = scalar_lea.hbm %s724_s2, 16  ;;  %s485_s17 = int_to_ptr.hbm [resolvable:$true] %s484_s17 }
  0x3d   : > { %s486_s29 = scalar_lea.hbm %s485_s17, 8  ;;  %p491_p10 = scmp.lt.s32.totalorder %s485_s17, %s724_s2 }
  0x3e   : > { %v204_v3 = vmul.f32 1.442695, %v203_v2  ;;  %p487_p6 = scmp.ne.s32.totalorder %s485_s17, %s486_s29  ;;  %p492_p2 = scmp.lt.s32.totalorder %s490_s19, %s486_s29 }
  0x40   : > { %404 = vpow2.f32 %v204_v3  ;;  %p488_p13 = pnand %p487_p6, %p607_p11  ;;  %p493_p9 = por %p492_p2, %p491_p10 }
  0x42   : > { %p489_p3 = pneg %p488_p13 }
  0x44   : > { %p494_p0 = pnand %p493_p9, %p489_p3 }
  0x46   : > { %v405_v4 = vpop.eup %404 }
  0x47   : > { %v206_v5 = vadd.f32 1.0, %v405_v4 }
  0x49   : > { %406 = vrcp.f32 %v206_v5 }
  0x4a   : > { %408 = vlog2.f32 %v206_v5 }
  0x4f   : > { %v407_v6 = vpop.eup %406 }
  0x50   : > { %v208_v7 = vmul.f32 %v407_v6, %v206_v5  ;;  %v409_v14 = vpop.eup %408 }
  0x51   : > { %v215_v19 = vmul.f32 0.6931472, %v409_v14 }
  0x52   : > { %v209_v8 = vsub.f32 2.0, %v208_v7 }
  0x53   : > { %v216_v22 = vadd.f32 %v215_v19, %v213_v18 }
  0x54   : > { %v210_v9 = vmul.f32 %v407_v6, %v209_v8 }
  0x56   : > { %v218_v11 = vmul.f32 %v405_v4, %v210_v9 }
  0x58   : > { %v219_v15 = vsel %vm217_vm0, %v210_v9, %v218_v11 }
  0x59   : > { %v220_v16 = vadd.f32 %v219_v15, %v201_v10  ;;  %v221_v17 = vmul.f32 %v219_v15, %v201_v10 }
  0x5b   : > { %v222_v20 = vmul.f32 2.0, %v221_v17 }
  0x5d   : > { %v223_v21 = vsub.f32 %v220_v16, %v222_v20 }
  0x5f   : > { %v224_v23 = vmul.f32 %v223_v21, %v223_v21 }
  0x61   : > { %v225_v24 = vmul.f32 %v224_v23, %v201_v10 }
  0x63   : > { %v226_v25 = vmul.f32 %v225_v24, %v216_v22 }
  0x65   : > { %228 = vst [vmem:[%s199_s8] sm:$0xff] %v226_v25 }
  0x66   : > { %497 = shalt.err (!%p494_p0)
}
  0x67   : > { %357 = dma.vmem_to_hbm [thread:$0]  (%p607_p11), %s243_s14, 128, %s245_s16, %s230_s13  }
  0x68 PF: > { %s256_s23 = sand.u32 1, %s528_s9   ;;  %p731_p1 = scmp.ge.s32.totalorder %s540_s12, 2 }
  0x69   : > { %s257_s27 = scalar_lea.sflag [#allocation4], %s256_s23 }
  0x6a   : > { %p367_p4 = pnand %p731_p1, %p611_p12 }
  0x6c   : > { %p368_p7 = pneg %p367_p4 }
  0x6e   : > { %523 = dma.done.wait (%p368_p7), %s257_s27, 128  }
  0x6f   : > { %525 = vsyncadd (%p368_p7), %s257_s27, 4294967168  ;;  %p18_p5 = scmp.ge.s32.totalorder %s582_s15, 4   ;;  %s732_s9 = smov %s532_s10 }
  0x70   : > { %s733_s10 = smov %s536_s11  ;;  %s734_s11 = smov %s594_s18 }
  0x71   : > { %s735_s12 = smov %s582_s15  ;;  %20 = sbr.rel (!%p18_p5) target bundleno = 7 (0x7), region = 86 }
  0x76   :  { %263 = vsyncpa [#allocation3], 1 }
  0x77   :  { %265 = vsyncpa [#allocation3 + $0x1], 1 }
  0x78   :  { %266 = vsyncpa [#allocation6], 1 }
  0x79   :  { %268 = vsyncpa [#allocation6 + $0x1], 1 }
  0x7a   :  { %269 = vsyncpa [#allocation4], 1 }
  0x7b   :  { %271 = vsyncpa [#allocation4 + $0x1], 1 }

</bundles_post_ra>
